<compile_context>
chip_gen: v7x
topology: tpu7x:2x2x1
jax: 0.10.0
libtpu: 0.0.40
codegen_flags: <defaults>
</compile_context>

<pallas_src>
import functools

import jax
import jax.numpy as jnp
from jax.experimental import pallas as pl
from jax.experimental.pallas import tpu as pltpu


def _sac_actor_kernel(
    obs_ref,
    w1_ref, b1_ref, ln_g_ref, ln_b_ref,
    w2_ref, b2_ref,
    w3_ref, b3_ref,
    w4_ref, b4_ref,
    out_ref,
    *, action_dim, feature_dim, log_std_min, log_std_max,
):
    cdt = w1_ref.dtype  # matmul operand dtype (f32 or bf16); accumulation is f32.

    x = obs_ref[...].astype(cdt)

    # Linear(repr_dim -> feature_dim), f32 accumulation on the MXU.
    h = jnp.dot(x, w1_ref[...], preferred_element_type=jnp.float32) + b1_ref[...]

    # LayerNorm(feature_dim), single-pass statistics (independent XLU reductions).
    # Padded lanes of h are exactly zero, so summing over the padded width and
    # dividing by the real feature_dim is exact (PyTorch: biased var, eps=1e-5).
    inv_d = 1.0 / float(feature_dim)
    s = jnp.sum(h, axis=-1, keepdims=True)
    s2 = jnp.sum(h * h, axis=-1, keepdims=True)
    mean = s * inv_d
    var = s2 * inv_d - mean * mean
    h = (h - mean) * jax.lax.rsqrt(var + 1e-5)
    h = h * ln_g_ref[...] + ln_b_ref[...]  # padded gamma/beta lanes are 0 -> re-zero padding

    # Tanh
    h = jnp.tanh(h)

    # Linear(feature_dim -> hidden_dim) + ReLU
    h = jnp.dot(h.astype(cdt), w2_ref[...], preferred_element_type=jnp.float32) + b2_ref[...]
    h = jnp.maximum(h, 0.0)

    # Linear(hidden_dim -> hidden_dim) + ReLU
    h = jnp.dot(h.astype(cdt), w3_ref[...], preferred_element_type=jnp.float32) + b3_ref[...]
    h = jnp.maximum(h, 0.0)

    # Linear(hidden_dim -> 2*action_dim), padded to a full 128-lane slab.
    out = jnp.dot(h.astype(cdt), w4_ref[...], preferred_element_type=jnp.float32) + b4_ref[...]

    # Lanes [0, A) hold mu, lanes [A, 2A) hold log_std: clip+exp only there,
    # then a single lane-dense (unmasked) store of the whole slab.
    lane = jax.lax.broadcasted_iota(jnp.int32, out.shape, 1)
    is_log_std = (lane >= action_dim) & (lane < 2 * action_dim)
    std = jnp.exp(jnp.clip(out, log_std_min, log_std_max))
    out_ref[...] = jnp.where(is_log_std, std, out)
    # TODO(synk): utils.SquashedNormal is a torch.distributions object (sampling /
    # log_prob machinery); the kernel returns its defining parameters (mu, std).


def _round_up(x, m):
    return ((x + m - 1) // m) * m


def sac_actor_forward(obs, params, *, action_dim, log_std_bounds,
                      block_b=128, matmul_dtype=jnp.float32):
    """Fused SACActor forward. Returns (mu, std) of the policy distribution."""
    B, repr_dim = obs.shape
    feature_dim = params["w1"].shape[1]
    hidden_dim = params["w2"].shape[1]
    out_dim = 2 * action_dim
    log_std_min, log_std_max = log_std_bounds

    # Pad every layer width to a multiple of 128 lanes (zero rows/columns are
    # mathematically inert through Linear/ReLU; LayerNorm handled in-kernel).
    rp = _round_up(repr_dim, 128)
    fp = _round_up(feature_dim, 128)
    hp = _round_up(hidden_dim, 128)
    op = _round_up(out_dim, 128)

    # Batch tiling: whole batch in one step when small, else 128-row blocks.
    TB = min(block_b, _round_up(B, 8))
    Bp = _round_up(B, TB)

    def pad_w(w, r, c):
        buf = jnp.zeros((r, c), matmul_dtype)
        return buf.at[: w.shape[0], : w.shape[1]].set(w.astype(matmul_dtype))

    def pad_v(v, c):
        buf = jnp.zeros((1, c), jnp.float32)
        return buf.at[:, : v.shape[-1]].set(v.reshape(1, -1).astype(jnp.float32))

    obs_p = jnp.zeros((Bp, rp), obs.dtype).at[:B, :repr_dim].set(obs)
    w1 = pad_w(params["w1"], rp, fp); b1 = pad_v(params["b1"], fp)
    ln_g = pad_v(params["ln_g"], fp); ln_b = pad_v(params["ln_b"], fp)
    w2 = pad_w(params["w2"], fp, hp); b2 = pad_v(params["b2"], hp)
    w3 = pad_w(params["w3"], hp, hp); b3 = pad_v(params["b3"], hp)
    w4 = pad_w(params["w4"], hp, op); b4 = pad_v(params["b4"], op)

    kernel = functools.partial(
        _sac_actor_kernel,
        action_dim=action_dim,
        feature_dim=feature_dim,
        log_std_min=float(log_std_min),
        log_std_max=float(log_std_max),
    )

    # obs / out tiles move per grid step; weights use a constant index_map so
    # they stay resident in VMEM across all grid steps (no re-DMA).
    obs_spec = pl.BlockSpec((TB, rp), lambda i: (i, 0))
    out_spec = pl.BlockSpec((TB, op), lambda i: (i, 0))
    resident = lambda shape: pl.BlockSpec(shape, lambda i: (0, 0))

    in_specs = [
        obs_spec,
        resident((rp, fp)), resident((1, fp)), resident((1, fp)), resident((1, fp)),
        resident((fp, hp)), resident((1, hp)),
        resident((hp, hp)), resident((1, hp)),
        resident((hp, op)), resident((1, op)),
    ]

    weight_bytes = sum(int(a.size) * a.dtype.itemsize
                       for a in (w1, b1, ln_g, ln_b, w2, b2, w3, b3, w4, b4))
    cost = pl.CostEstimate(
        flops=2 * Bp * (rp * fp + fp * hp + hp * hp + hp * op),
        transcendentals=Bp * (fp + op),  # tanh + exp (approx)
        bytes_accessed=weight_bytes
        + int(obs_p.size) * obs_p.dtype.itemsize
        + Bp * op * 4,
    )

    out = pl.pallas_call(
        kernel,
        out_shape=jax.ShapeDtypeStruct((Bp, op), jnp.float32),
        grid=(Bp // TB,),
        in_specs=in_specs,
        out_specs=out_spec,
        compiler_params=pltpu.CompilerParams(
            dimension_semantics=("parallel",),   # shard batch blocks across TCs (v7x)
            vmem_limit_bytes=32 * 1024 * 1024,   # explicit; footprint is tiny anyway
        ),
        cost_estimate=cost,
    )(obs_p, w1, b1, ln_g, ln_b, w2, b2, w3, b3, w4, b4)

    mu = out[:B, :action_dim]
    std = out[:B, action_dim:2 * action_dim]
    return mu, std


def init_params(key, repr_dim, feature_dim, hidden_dim, action_dim):
    """Deterministic synthetic parameters (shapes match SACActor.__init__);
    weights stored as [in_dim, out_dim] so each layer is y = x @ W + b."""
    ks = jax.random.split(key, 8)
    out_dim = action_dim * 2

    def lin(kw, kb, fan_in, fan_out):
        w = jax.random.normal(kw, (fan_in, fan_out), jnp.float32) / jnp.sqrt(fan_in)
        b = 0.01 * jax.random.normal(kb, (1, fan_out), jnp.float32)
        return w, b

    w1, b1 = lin(ks[0], ks[1], repr_dim, feature_dim)
    w2, b2 = lin(ks[2], ks[3], feature_dim, hidden_dim)
    w3, b3 = lin(ks[4], ks[5], hidden_dim, hidden_dim)
    w4, b4 = lin(ks[6], ks[7], hidden_dim, out_dim)
    return {
        "w1": w1, "b1": b1,
        "ln_g": jnp.ones((1, feature_dim), jnp.float32),
        "ln_b": jnp.zeros((1, feature_dim), jnp.float32),
        "w2": w2, "b2": b2,
        "w3": w3, "b3": b3,
        "w4": w4, "b4": b4,
    }


def _reference(obs, p, action_dim, log_std_bounds):
    h = obs @ p["w1"] + p["b1"]
    m = h.mean(-1, keepdims=True)
    v = ((h - m) ** 2).mean(-1, keepdims=True)
    h = (h - m) / jnp.sqrt(v + 1e-5) * p["ln_g"] + p["ln_b"]
    h = jnp.tanh(h)
    h = jnp.maximum(h @ p["w2"] + p["b2"], 0.0)
    h = jnp.maximum(h @ p["w3"] + p["b3"], 0.0)
    out = h @ p["w4"] + p["b4"]
    mu, log_std = out[:, :action_dim], out[:, action_dim:]
    log_std = jnp.clip(log_std, *log_std_bounds)
    return mu, jnp.exp(log_std)


if __name__ == "__main__":
    repr_dim, feature_dim, hidden_dim = 64, 64, 64
    action_shape = (4,)
    action_dim = action_shape[0]
    log_std_bounds = (-10.0, 2.0)

    key = jax.random.PRNGKey(0)
    k_obs, k_obs_big, k_params = jax.random.split(key, 3)
    params = init_params(k_params, repr_dim, feature_dim, hidden_dim, action_dim)

    # 1) Small batch (single grid step), f32 matmuls: exact check.
    obs = jax.random.normal(k_obs, (8, repr_dim), jnp.float32)
    mu, std = sac_actor_forward(obs, params, action_dim=action_dim,
                                log_std_bounds=log_std_bounds)
    jax.block_until_ready((mu, std))
    mu_r, std_r = _reference(obs, params, action_dim, log_std_bounds)
    assert jnp.allclose(mu, mu_r, atol=1e-4, rtol=1e-4)
    assert jnp.allclose(std, std_r, atol=1e-4, rtol=1e-4)

    # 2) Larger batch: grid of 2 blocks of 128 rows, weights stay VMEM-resident.
    obs_big = jax.random.normal(k_obs_big, (256, repr_dim), jnp.float32)
    mu_b, std_b = sac_actor_forward(obs_big, params, action_dim=action_dim,
                                    log_std_bounds=log_std_bounds)
    jax.block_until_ready((mu_b, std_b))
    mu_br, std_br = _reference(obs_big, params, action_dim, log_std_bounds)
    assert jnp.allclose(mu_b, mu_br, atol=1e-4, rtol=1e-4)
    assert jnp.allclose(std_b, std_br, atol=1e-4, rtol=1e-4)

    # 3) bf16 matmul operands (v6e/v7x MXU path); element-wise math stays f32.
    #    Loose tolerance: this is a precision-reduced fast path, not bit-exact.
    mu_h, std_h = sac_actor_forward(obs_big, params, action_dim=action_dim,
                                    log_std_bounds=log_std_bounds,
                                    matmul_dtype=jnp.bfloat16)
    jax.block_until_ready((mu_h, std_h))
    assert jnp.allclose(mu_h, mu_br, atol=3e-1, rtol=3e-1)
    assert jnp.allclose(std_h, std_br, atol=3e-1, rtol=3e-1)

    print("KERNEL_OK")
</pallas_src>

<mosaic_0001>
module attributes {stable_mosaic.version = 11 : i64} {
  func.func @_sac_actor_kernel(%arg0: i32, %arg1: memref<8x128xf32, #tpu.memory_space<vmem>>, %arg2: memref<128x128xf32, #tpu.memory_space<vmem>>, %arg3: memref<1x128xf32, #tpu.memory_space<vmem>>, %arg4: memref<1x128xf32, #tpu.memory_space<vmem>>, %arg5: memref<1x128xf32, #tpu.memory_space<vmem>>, %arg6: memref<128x128xf32, #tpu.memory_space<vmem>>, %arg7: memref<1x128xf32, #tpu.memory_space<vmem>>, %arg8: memref<128x128xf32, #tpu.memory_space<vmem>>, %arg9: memref<1x128xf32, #tpu.memory_space<vmem>>, %arg10: memref<128x128xf32, #tpu.memory_space<vmem>>, %arg11: memref<1x128xf32, #tpu.memory_space<vmem>>, %arg12: memref<8x128xf32, #tpu.memory_space<vmem>>) attributes {dimension_semantics = [#tpu.dimension_semantics<parallel>], iteration_bounds = array<i64: 1>, scalar_prefetch = 0 : i64, scratch_operands = 0 : i64, tpu.core_type = #tpu.core_type<tc>, window_params = [{transform_indices = @transform_0, window_bounds = array<i64: 8, 128>}, {pipeline_mode = #tpu.pipeline_mode<synchronous>, transform_indices = @transform_1, window_bounds = array<i64: 128, 128>}, {pipeline_mode = #tpu.pipeline_mode<synchronous>, transform_indices = @transform_2, window_bounds = array<i64: 1, 128>}, {pipeline_mode = #tpu.pipeline_mode<synchronous>, transform_indices = @transform_3, window_bounds = array<i64: 1, 128>}, {pipeline_mode = #tpu.pipeline_mode<synchronous>, transform_indices = @transform_4, window_bounds = array<i64: 1, 128>}, {pipeline_mode = #tpu.pipeline_mode<synchronous>, transform_indices = @transform_5, window_bounds = array<i64: 128, 128>}, {pipeline_mode = #tpu.pipeline_mode<synchronous>, transform_indices = @transform_6, window_bounds = array<i64: 1, 128>}, {pipeline_mode = #tpu.pipeline_mode<synchronous>, transform_indices = @transform_7, window_bounds = array<i64: 128, 128>}, {pipeline_mode = #tpu.pipeline_mode<synchronous>, transform_indices = @transform_8, window_bounds = array<i64: 1, 128>}, {pipeline_mode = #tpu.pipeline_mode<synchronous>, transform_indices = @transform_9, window_bounds = array<i64: 128, 128>}, {pipeline_mode = #tpu.pipeline_mode<synchronous>, transform_indices = @transform_10, window_bounds = array<i64: 1, 128>}, {transform_indices = @transform_11, window_bounds = array<i64: 8, 128>}]} {
    %c0 = arith.constant 0 : index
    %c0_0 = arith.constant 0 : index
    %0 = vector.load %arg1[%c0, %c0_0] : memref<8x128xf32, #tpu.memory_space<vmem>>, vector<8x128xf32>
    %c0_1 = arith.constant 0 : index
    %c0_2 = arith.constant 0 : index
    %1 = vector.load %arg2[%c0_1, %c0_2] : memref<128x128xf32, #tpu.memory_space<vmem>>, vector<128x128xf32>
    %cst = arith.constant dense<0.000000e+00> : vector<8x128xf32>
    %2 = tpu.matmul %0, %1, %cst {dimension_numbers = #tpu.dot_dimension_numbers<[1], [0], [0], [1], [0, 0, 1, 1], [], []>} : vector<8x128xf32>, vector<128x128xf32>, vector<8x128xf32> -> vector<8x128xf32>
    %c0_3 = arith.constant 0 : index
    %c0_4 = arith.constant 0 : index
    %3 = vector.load %arg3[%c0_3, %c0_4] : memref<1x128xf32, #tpu.memory_space<vmem>>, vector<1x128xf32>
    %4 = vector.broadcast %3 : vector<1x128xf32> to vector<8x128xf32>
    %5 = arith.addf %2, %4 : vector<8x128xf32>
    %cst_5 = arith.constant dense<0.000000e+00> : vector<8xf32>
    %6 = vector.multi_reduction <add>, %5, %cst_5 [1] : vector<8x128xf32> to vector<8xf32>
    %7 = vector.shape_cast %6 : vector<8xf32> to vector<8x1xf32>
    %8 = arith.mulf %5, %5 : vector<8x128xf32>
    %cst_6 = arith.constant dense<0.000000e+00> : vector<8xf32>
    %9 = vector.multi_reduction <add>, %8, %cst_6 [1] : vector<8x128xf32> to vector<8xf32>
    %10 = vector.shape_cast %9 : vector<8xf32> to vector<8x1xf32>
    %cst_7 = arith.constant 1.562500e-02 : f32
    %11 = vector.broadcast %cst_7 : f32 to vector<8x1xf32>
    %12 = arith.mulf %7, %11 : vector<8x1xf32>
    %cst_8 = arith.constant 1.562500e-02 : f32
    %13 = vector.broadcast %cst_8 : f32 to vector<8x1xf32>
    %14 = arith.mulf %10, %13 : vector<8x1xf32>
    %15 = arith.mulf %12, %12 : vector<8x1xf32>
    %16 = arith.subf %14, %15 : vector<8x1xf32>
    %17 = vector.broadcast %12 : vector<8x1xf32> to vector<8x128xf32>
    %18 = arith.subf %5, %17 : vector<8x128xf32>
    %cst_9 = arith.constant 9.99999974E-6 : f32
    %19 = vector.broadcast %cst_9 : f32 to vector<8x1xf32>
    %20 = arith.addf %16, %19 : vector<8x1xf32>
    %21 = math.rsqrt %20 : vector<8x1xf32>
    %22 = vector.broadcast %21 : vector<8x1xf32> to vector<8x128xf32>
    %23 = arith.mulf %18, %22 : vector<8x128xf32>
    %c0_10 = arith.constant 0 : index
    %c0_11 = arith.constant 0 : index
    %24 = vector.load %arg4[%c0_10, %c0_11] : memref<1x128xf32, #tpu.memory_space<vmem>>, vector<1x128xf32>
    %25 = vector.broadcast %24 : vector<1x128xf32> to vector<8x128xf32>
    %26 = arith.mulf %23, %25 : vector<8x128xf32>
    %c0_12 = arith.constant 0 : index
    %c0_13 = arith.constant 0 : index
    %27 = vector.load %arg5[%c0_12, %c0_13] : memref<1x128xf32, #tpu.memory_space<vmem>>, vector<1x128xf32>
    %28 = vector.broadcast %27 : vector<1x128xf32> to vector<8x128xf32>
    %29 = arith.addf %26, %28 : vector<8x128xf32>
    %30 = math.tanh %29 : vector<8x128xf32>
    %c0_14 = arith.constant 0 : index
    %c0_15 = arith.constant 0 : index
    %31 = vector.load %arg6[%c0_14, %c0_15] : memref<128x128xf32, #tpu.memory_space<vmem>>, vector<128x128xf32>
    %cst_16 = arith.constant dense<0.000000e+00> : vector<8x128xf32>
    %32 = tpu.matmul %30, %31, %cst_16 {dimension_numbers = #tpu.dot_dimension_numbers<[1], [0], [0], [1], [0, 0, 1, 1], [], []>} : vector<8x128xf32>, vector<128x128xf32>, vector<8x128xf32> -> vector<8x128xf32>
    %c0_17 = arith.constant 0 : index
    %c0_18 = arith.constant 0 : index
    %33 = vector.load %arg7[%c0_17, %c0_18] : memref<1x128xf32, #tpu.memory_space<vmem>>, vector<1x128xf32>
    %34 = vector.broadcast %33 : vector<1x128xf32> to vector<8x128xf32>
    %35 = arith.addf %32, %34 : vector<8x128xf32>
    %cst_19 = arith.constant 0.000000e+00 : f32
    %36 = vector.broadcast %cst_19 : f32 to vector<8x128xf32>
    %37 = arith.maximumf %35, %36 : vector<8x128xf32>
    %c0_20 = arith.constant 0 : index
    %c0_21 = arith.constant 0 : index
    %38 = vector.load %arg8[%c0_20, %c0_21] : memref<128x128xf32, #tpu.memory_space<vmem>>, vector<128x128xf32>
    %cst_22 = arith.constant dense<0.000000e+00> : vector<8x128xf32>
    %39 = tpu.matmul %37, %38, %cst_22 {dimension_numbers = #tpu.dot_dimension_numbers<[1], [0], [0], [1], [0, 0, 1, 1], [], []>} : vector<8x128xf32>, vector<128x128xf32>, vector<8x128xf32> -> vector<8x128xf32>
    %c0_23 = arith.constant 0 : index
    %c0_24 = arith.constant 0 : index
    %40 = vector.load %arg9[%c0_23, %c0_24] : memref<1x128xf32, #tpu.memory_space<vmem>>, vector<1x128xf32>
    %41 = vector.broadcast %40 : vector<1x128xf32> to vector<8x128xf32>
    %42 = arith.addf %39, %41 : vector<8x128xf32>
    %cst_25 = arith.constant 0.000000e+00 : f32
    %43 = vector.broadcast %cst_25 : f32 to vector<8x128xf32>
    %44 = arith.maximumf %42, %43 : vector<8x128xf32>
    %c0_26 = arith.constant 0 : index
    %c0_27 = arith.constant 0 : index
    %45 = vector.load %arg10[%c0_26, %c0_27] : memref<128x128xf32, #tpu.memory_space<vmem>>, vector<128x128xf32>
    %cst_28 = arith.constant dense<0.000000e+00> : vector<8x128xf32>
    %46 = tpu.matmul %44, %45, %cst_28 {dimension_numbers = #tpu.dot_dimension_numbers<[1], [0], [0], [1], [0, 0, 1, 1], [], []>} : vector<8x128xf32>, vector<128x128xf32>, vector<8x128xf32> -> vector<8x128xf32>
    %c0_29 = arith.constant 0 : index
    %c0_30 = arith.constant 0 : index
    %47 = vector.load %arg11[%c0_29, %c0_30] : memref<1x128xf32, #tpu.memory_space<vmem>>, vector<1x128xf32>
    %48 = vector.broadcast %47 : vector<1x128xf32> to vector<8x128xf32>
    %49 = arith.addf %46, %48 : vector<8x128xf32>
    %50 = tpu.iota {dimensions = array<i32: 1>} : vector<8x128xi32>
    %c4_i32 = arith.constant 4 : i32
    %51 = vector.broadcast %c4_i32 : i32 to vector<8x128xi32>
    %52 = arith.cmpi sge, %50, %51 : vector<8x128xi32>
    %c8_i32 = arith.constant 8 : i32
    %53 = vector.broadcast %c8_i32 : i32 to vector<8x128xi32>
    %54 = arith.cmpi slt, %50, %53 : vector<8x128xi32>
    %55 = arith.andi %52, %54 : vector<8x128xi1>
    %cst_31 = arith.constant -1.000000e+01 : f32
    %cst_32 = arith.constant 2.000000e+00 : f32
    %56 = vector.broadcast %cst_31 : f32 to vector<8x128xf32>
    %57 = arith.maximumf %56, %49 : vector<8x128xf32>
    %58 = vector.broadcast %cst_32 : f32 to vector<8x128xf32>
    %59 = arith.minimumf %58, %57 : vector<8x128xf32>
    %60 = math.exp %59 : vector<8x128xf32>
    %61 = arith.select %55, %60, %49 : vector<8x128xi1>, vector<8x128xf32>
    %c0_33 = arith.constant 0 : index
    %c0_34 = arith.constant 0 : index
    %62 = vector.load %arg12[%c0_33, %c0_34] : memref<8x128xf32, #tpu.memory_space<vmem>>, vector<8x128xf32>
    tpu.vector_store %arg12[%c0_33, %c0_34], %61 {strides = array<i32>} : memref<8x128xf32, #tpu.memory_space<vmem>>, vector<8x128xf32>,
    return
  }
  func.func @transform_0(%arg0: i32) -> (i32, i32) {
    %c0_i32 = arith.constant 0 : i32
    %c0_i32_0 = arith.constant 0 : i32
    return %arg0, %c0_i32 : i32, i32
  }
  func.func @transform_1(%arg0: i32) -> (i32, i32) {
    %c0_i32 = arith.constant 0 : i32
    %c0_i32_0 = arith.constant 0 : i32
    %c0_i32_1 = arith.constant 0 : i32
    return %c0_i32, %c0_i32_0 : i32, i32
  }
  func.func @transform_2(%arg0: i32) -> (i32, i32) {
    %c0_i32 = arith.constant 0 : i32
    %c0_i32_0 = arith.constant 0 : i32
    %c0_i32_1 = arith.constant 0 : i32
    return %c0_i32, %c0_i32_0 : i32, i32
  }
  func.func @transform_3(%arg0: i32) -> (i32, i32) {
    %c0_i32 = arith.constant 0 : i32
    %c0_i32_0 = arith.constant 0 : i32
    %c0_i32_1 = arith.constant 0 : i32
    return %c0_i32, %c0_i32_0 : i32, i32
  }
  func.func @transform_4(%arg0: i32) -> (i32, i32) {
    %c0_i32 = arith.constant 0 : i32
    %c0_i32_0 = arith.constant 0 : i32
    %c0_i32_1 = arith.constant 0 : i32
    return %c0_i32, %c0_i32_0 : i32, i32
  }
  func.func @transform_5(%arg0: i32) -> (i32, i32) {
    %c0_i32 = arith.constant 0 : i32
    %c0_i32_0 = arith.constant 0 : i32
    %c0_i32_1 = arith.constant 0 : i32
    return %c0_i32, %c0_i32_0 : i32, i32
  }
  func.func @transform_6(%arg0: i32) -> (i32, i32) {
    %c0_i32 = arith.constant 0 : i32
    %c0_i32_0 = arith.constant 0 : i32
    %c0_i32_1 = arith.constant 0 : i32
    return %c0_i32, %c0_i32_0 : i32, i32
  }
  func.func @transform_7(%arg0: i32) -> (i32, i32) {
    %c0_i32 = arith.constant 0 : i32
    %c0_i32_0 = arith.constant 0 : i32
    %c0_i32_1 = arith.constant 0 : i32
    return %c0_i32, %c0_i32_0 : i32, i32
  }
  func.func @transform_8(%arg0: i32) -> (i32, i32) {
    %c0_i32 = arith.constant 0 : i32
    %c0_i32_0 = arith.constant 0 : i32
    %c0_i32_1 = arith.constant 0 : i32
    return %c0_i32, %c0_i32_0 : i32, i32
  }
  func.func @transform_9(%arg0: i32) -> (i32, i32) {
    %c0_i32 = arith.constant 0 : i32
    %c0_i32_0 = arith.constant 0 : i32
    %c0_i32_1 = arith.constant 0 : i32
    return %c0_i32, %c0_i32_0 : i32, i32
  }
  func.func @transform_10(%arg0: i32) -> (i32, i32) {
    %c0_i32 = arith.constant 0 : i32
    %c0_i32_0 = arith.constant 0 : i32
    %c0_i32_1 = arith.constant 0 : i32
    return %c0_i32, %c0_i32_0 : i32, i32
  }
  func.func @transform_11(%arg0: i32) -> (i32, i32) {
    %c0_i32 = arith.constant 0 : i32
    %c0_i32_0 = arith.constant 0 : i32
    return %arg0, %c0_i32 : i32, i32
  }
}

</mosaic_0001>

<bundles_post_ra>
// kernel: tpu_custom_call.1
= control target key start
LH: loop header
LB: loop body
LE: loop exit
PB: predicated region body
PF: predicated region fallthrough
CT: control target
= control target key end

     0   :  { %16 = vsyncpa [#allocation3], 0  ;;  %s1224_s0 = inlined_call_operand.hbm [shape: f32[8,128], index: 0, kind: input, shape index: {}]   ;;  %s1225_s1 = inlined_call_operand.hbm [shape: f32[128,128], index: 1, kind: input, shape index: {}]   ;;  %s1226_s2 = inlined_call_operand.vmem [shape: f32[1,128], index: 2, kind: input, shape index: {}]   ;;  %s1227_s3 = inlined_call_operand.vmem [shape: f32[1,128], index: 3, kind: input, shape index: {}]   ;;  %s1228_s4 = inlined_call_operand.vmem [shape: f32[1,128], index: 4, kind: input, shape index: {}]   ;;  %s1229_s5 = inlined_call_operand.hbm [shape: f32[128,128], index: 5, kind: input, shape index: {}]   ;;  %s1230_s6 = inlined_call_operand.vmem [shape: f32[1,128], index: 6, kind: input, shape index: {}]   ;;  %s1231_s7 = inlined_call_operand.hbm [shape: f32[128,128], index: 7, kind: input, shape index: {}]   ;;  %s1232_s8 = inlined_call_operand.vmem [shape: f32[1,128], index: 8, kind: input, shape index: {}]   ;;  %s1233_s9 = inlined_call_operand.hbm [shape: f32[128,128], index: 9, kind: input, shape index: {}]   ;;  %s1234_s10 = inlined_call_operand.vmem [shape: f32[1,128], index: 10, kind: input, shape index: {}]   ;;  %s1235_s11 = inlined_call_operand.hbm [shape: f32[8,128], index: 11, kind: output, shape index: {}]  }
   0x1   :  { %17 = vsyncpa [#allocation6], 0 }
   0x2   :  { %18 = vsyncpa [#allocation9], 0 }
   0x3   :  { %19 = vsyncpa [#allocation4], 0  ;;  %s1005_s17 = smov [#allocation5]   ;;  %s865_s21 = scalar_lea.hbm %s1225_s1, 2048 }
   0x4   :  { %s35_s18 = sshll.u32 %s1005_s17, 4  ;;  %p866_p0 = scmp.ne.s32.totalorder %s1225_s1, %s865_s21  ;;  %s36_s18 = int_to_ptr.vmem [resolvable:$true] %s35_s18 }
   0x5   :  { %p869_p1 = scmp.lt.u32.totalorder %s865_s21, %s1225_s1 }
   0x7   :  { %p871_p2 = pnand %p869_p1, %p866_p0 }
   0x9   :  { %874 = shalt.err (!%p871_p2)
}
   0xa   :  { %s875_s26 = scalar_lea.vmem %s36_s18, 2048  ;;  %p880_p4 = scmp.lt.s32.totalorder %s36_s18, %s36_s18 }
   0xb   :  { %p876_p3 = scmp.ne.s32.totalorder %s36_s18, %s875_s26  ;;  %p881_p5 = scmp.lt.s32.totalorder %s875_s26, %s875_s26 }
   0xd   :  { %p882_p6 = por %p881_p5, %p880_p4 }
   0xf   :  { %p883_p7 = pnand %p882_p6, %p876_p3 }
  0x11   :  { %886 = shalt.err (!%p883_p7)
}
  0x12   :  { %s1006_s27 = smov 128   ;;  %s1007_s28 = smov 8  }
  0x13   :  { %41 = dma.hbm_to_vmem [thread:$0]  %s1225_s1, 2048, %s36_s18, [#allocation6], %s1006_s27, %s1006_s27, %s1007_s28  }
  0x14   :  { %s1008_s12 = smov [#allocation8]   ;;  %s1009_s14 = smov [#allocation2]  }
  0x15   :  { %s67_s13 = sshll.u32 %s1008_s12, 4  ;;  %s26_s15 = sshll.u32 %s1009_s14, 4  ;;  %s68_s13 = int_to_ptr.vmem [resolvable:$true] %s67_s13  ;;  %s27_s15 = int_to_ptr.vmem [resolvable:$true] %s26_s15 }
  0x16   :  { %s887_s19 = scalar_lea.hbm %s1231_s7, 2048 }
  0x17   :  { %p888_p8 = scmp.ne.s32.totalorder %s1231_s7, %s887_s19  ;;  %p891_p9 = scmp.lt.u32.totalorder %s887_s19, %s1231_s7 }
  0x19   :  { %p893_p10 = pnand %p891_p9, %p888_p8 }
  0x1b   :  { %896 = shalt.err (!%p893_p10)
}
  0x1c   :  { %s897_s1 = scalar_lea.vmem %s68_s13, 2048  ;;  %p902_p12 = scmp.lt.s32.totalorder %s68_s13, %s68_s13 }
  0x1d   :  { %p898_p11 = scmp.ne.s32.totalorder %s68_s13, %s897_s1  ;;  %p903_p13 = scmp.lt.s32.totalorder %s897_s1, %s897_s1 }
  0x1f   :  { %p904_p0 = por %p903_p13, %p902_p12 }
  0x21   :  { %p905_p1 = pnand %p904_p0, %p898_p11 }
  0x23   :  { %908 = shalt.err (!%p905_p1)
}
  0x24   :  { %73 = dma.hbm_to_vmem [thread:$0]  %s1231_s7, 2048, %s68_s13, [#allocation9], %s1006_s27, %s1006_s27, %s1007_s28  }
  0x25   :  { %s909_s29 = scalar_lea.hbm %s1224_s0, 128 }
  0x26   :  { %p910_p2 = scmp.ne.s32.totalorder %s1224_s0, %s909_s29  ;;  %p913_p3 = scmp.lt.u32.totalorder %s909_s29, %s1224_s0 }
  0x28   :  { %p915_p4 = pnand %p913_p3, %p910_p2 }
  0x2a   :  { %918 = shalt.err (!%p915_p4)
}
  0x2b   :  { %s919_s17 = scalar_lea.vmem %s27_s15, 128  ;;  %p924_p6 = scmp.lt.s32.totalorder %s27_s15, %s27_s15 }
  0x2c   :  { %p920_p5 = scmp.ne.s32.totalorder %s27_s15, %s919_s17  ;;  %p925_p7 = scmp.lt.s32.totalorder %s919_s17, %s919_s17 }
  0x2e   :  { %p926_p8 = por %p925_p7, %p924_p6 }
  0x30   :  { %p927_p9 = pnand %p926_p8, %p920_p5 }
  0x32   :  { %930 = shalt.err (!%p927_p9)
}
  0x33   :  { %29 = dma.hbm_to_vmem [thread:$0]  %s1224_s0, 128, %s27_s15, [#allocation3]  }
  0x34   :  { %s1010_s19 = smov [#allocation7]   ;;  %s1011_s21 = smov [#allocation10]  }
  0x35   :  { %s53_s20 = sshll.u32 %s1010_s19, 4  ;;  %s81_s22 = sshll.u32 %s1011_s21, 4  ;;  %s54_s20 = int_to_ptr.vmem [resolvable:$true] %s53_s20  ;;  %s82_s22 = int_to_ptr.vmem [resolvable:$true] %s81_s22 }
  0x36   :  { %s931_s18 = scalar_lea.hbm %s1229_s5, 2048 }
  0x37   :  { %p932_p10 = scmp.ne.s32.totalorder %s1229_s5, %s931_s18  ;;  %p935_p11 = scmp.lt.u32.totalorder %s931_s18, %s1229_s5 }
  0x39   :  { %p937_p12 = pnand %p935_p11, %p932_p10 }
  0x3b   :  { %940 = shalt.err (!%p937_p12)
}
  0x3c   :  { %s941_s0 = scalar_lea.vmem %s54_s20, 2048  ;;  %p946_p0 = scmp.lt.s32.totalorder %s54_s20, %s54_s20 }
  0x3d   :  { %p942_p13 = scmp.ne.s32.totalorder %s54_s20, %s941_s0  ;;  %p947_p1 = scmp.lt.s32.totalorder %s941_s0, %s941_s0 }
  0x3f   :  { %p948_p2 = por %p947_p1, %p946_p0 }
  0x41   :  { %p949_p3 = pnand %p948_p2, %p942_p13 }
  0x43   :  { %952 = shalt.err (!%p949_p3)
}
  0x44   :  { %59 = dma.hbm_to_vmem [thread:$0]  %s1229_s5, 2048, %s54_s20, [#allocation6], %s1006_s27, %s1006_s27, %s1007_s28  }
  0x45   :  { %s953_s16 = scalar_lea.hbm %s1233_s9, 2048 }
  0x46   :  { %p954_p4 = scmp.ne.s32.totalorder %s1233_s9, %s953_s16  ;;  %p957_p5 = scmp.lt.u32.totalorder %s953_s16, %s1233_s9 }
  0x48   :  { %p959_p6 = pnand %p957_p5, %p954_p4 }
  0x4a   :  { %962 = shalt.err (!%p959_p6)
}
  0x4b   :  { %s963_s21 = scalar_lea.vmem %s82_s22, 2048  ;;  %p968_p8 = scmp.lt.s32.totalorder %s82_s22, %s82_s22 }
  0x4c   :  { %p964_p7 = scmp.ne.s32.totalorder %s82_s22, %s963_s21  ;;  %p969_p9 = scmp.lt.s32.totalorder %s963_s21, %s963_s21 }
  0x4e   :  { %p970_p10 = por %p969_p9, %p968_p8 }
  0x50   :  { %p971_p11 = pnand %p970_p10, %p964_p7 }
  0x52   :  { %974 = shalt.err (!%p971_p11)
}
  0x53   :  { %87 = dma.hbm_to_vmem [thread:$0]  %s1233_s9, 2048, %s82_s22, [#allocation9], %s1006_s27, %s1006_s27, %s1007_s28  }
  0x54   :  { %997 = dma.done.wait [#allocation3], 128  }
  0x55   :  { %998 = vsyncadd [#allocation3], 4294967168 }
  0x56   :  { %999 = dma.done.wait [#allocation6], 4096  }
  0x57   :  { %1000 = vsyncadd [#allocation6], 4294963200 }
  0x58   :  { %1001 = dma.done.wait [#allocation9], 4096  }
  0x59   :  { %1002 = vsyncadd [#allocation9], 4294963200  ;;  %v1012_v0 = vmov 0.0|0.0   ;;  %vm1013_vm0 = vmmov 0   ;;  %v1014_v1 = vmov 0.0   ;;  %v106_v2 = vld [vmem:[#allocation5] sm:$0xff] }
  0x5a   :  { %752 = vmatprep.subr.bf16.mxu0 %v1012_v0  ;;  %644 = vmatprep.mubr.msk.f32.mxu0 %vm1013_vm0, %v1014_v1  ;;  %v107_v3 = vld [vmem:[#allocation5 + $0x8] sm:$0xff]  ;;  %v108_v4 = vld [vmem:[#allocation5 + $0x10] sm:$0xff]  ;;  %v109_v6 = vld [vmem:[#allocation5 + $0x18] sm:$0xff] }
  0x5b   :  { %776 = vmatprep.subr.bf16.mxu1 %v1012_v0  ;;  %679 = vmatprep.mubr.msk.f32.mxu1 %vm1013_vm0, %v1014_v1  ;;  %v753_v5 = vpack.c.bf16 %v107_v3, %v106_v2  ;;  %v756_v7 = vpack.c.bf16 %v109_v6, %v108_v4  ;;  %v110_v8 = vld [vmem:[#allocation5 + $0x20] sm:$0xff]  ;;  %v111_v9 = vld [vmem:[#allocation5 + $0x28] sm:$0xff]  ;;  %v112_v11 = vld [vmem:[#allocation5 + $0x30] sm:$0xff] }
  0x5c   :  { %v759_v10 = vpack.c.bf16 %v111_v9, %v110_v8  ;;  %v113_v12 = vld [vmem:[#allocation5 + $0x38] sm:$0xff]  ;;  %v114_v14 = vld [vmem:[#allocation5 + $0x40] sm:$0xff]  ;;  %v115_v15 = vld [vmem:[#allocation5 + $0x48] sm:$0xff] }
  0x5d   :  { %754 = vmatpush3.bf16.msra.mxu0 %v753_v5  ;;  %v762_v13 = vpack.c.bf16 %v113_v12, %v112_v11  ;;  %v765_v16 = vpack.c.bf16 %v115_v15, %v114_v14  ;;  %v116_v17 = vld [vmem:[#allocation5 + $0x50] sm:$0xff]  ;;  %v117_v18 = vld [vmem:[#allocation5 + $0x58] sm:$0xff]  ;;  %v118_v20 = vld [vmem:[#allocation5 + $0x60] sm:$0xff] }
  0x5e   :  { %755 = vmatprep.subr.bf16.mxu0 %v1012_v0  ;;  %v768_v19 = vpack.c.bf16 %v117_v18, %v116_v17  ;;  %v119_v21 = vld [vmem:[#allocation5 + $0x68] sm:$0xff]  ;;  %v120_v23 = vld [vmem:[#allocation5 + $0x70] sm:$0xff]  ;;  %v121_v24 = vld [vmem:[#allocation5 + $0x78] sm:$0xff] }
  0x5f   :  { %v771_v22 = vpack.c.bf16 %v119_v21, %v118_v20  ;;  %v774_v25 = vpack.c.bf16 %v121_v24, %v120_v23  ;;  %v105_v26 = vld [vmem:[#allocation2] sm:$0xff]  ;;  %v229_v32 = vld [vmem:[#allocation7] sm:$0xff]  ;;  %v230_v33 = vld [vmem:[#allocation7 + $0x8] sm:$0xff] }
  0x60   :  { %v538_v27 = vld [vmem:[%s1226_s2] ss:$0 sm:$0xff]  ;;  %v777_v34 = vpack.c.bf16 %v230_v33, %v229_v32  ;;  %v231_v35 = vld [vmem:[#allocation7 + $0x10] sm:$0xff]  ;;  %v233_v38 = vld [vmem:[#allocation7 + $0x20] sm:$0xff] }
  0x61   :  { %757 = vmatpush3.bf16.msra.mxu0 %v756_v7  ;;  %v232_v36 = vld [vmem:[#allocation7 + $0x18] sm:$0xff]  ;;  %v234_v39 = vld [vmem:[#allocation7 + $0x28] sm:$0xff]  ;;  %v235_v41 = vld [vmem:[#allocation7 + $0x30] sm:$0xff] }
  0x62   :  { %758 = vmatprep.subr.bf16.mxu0 %v1012_v0  ;;  %778 = vmatpush3.bf16.msra.mxu1 %v777_v34  ;;  %v780_v37 = vpack.c.bf16 %v232_v36, %v231_v35  ;;  %v783_v40 = vpack.c.bf16 %v234_v39, %v233_v38  ;;  %v236_v42 = vld [vmem:[#allocation7 + $0x38] sm:$0xff]  ;;  %v237_v44 = vld [vmem:[#allocation7 + $0x40] sm:$0xff]  ;;  %v238_v45 = vld [vmem:[#allocation7 + $0x48] sm:$0xff] }
  0x63   :  { %779 = vmatprep.subr.bf16.mxu1 %v1012_v0  ;;  %v786_v43 = vpack.c.bf16 %v236_v42, %v235_v41  ;;  %v789_v46 = vpack.c.bf16 %v238_v45, %v237_v44  ;;  %v239_v47 = vld [vmem:[#allocation7 + $0x50] sm:$0xff]  ;;  %v240_v48 = vld [vmem:[#allocation7 + $0x58] sm:$0xff]  ;;  %v241_v50 = vld [vmem:[#allocation7 + $0x60] sm:$0xff] }
  0x64   :  { %v792_v49 = vpack.c.bf16 %v240_v48, %v239_v47  ;;  %v242_v51 = vld [vmem:[#allocation7 + $0x68] sm:$0xff]  ;;  %v243_v53 = vld [vmem:[#allocation7 + $0x70] sm:$0xff]  ;;  %v244_v54 = vld [vmem:[#allocation7 + $0x78] sm:$0xff] }
  0x65   :  { %760 = vmatpush3.bf16.msra.mxu0 %v759_v10  ;;  %v795_v52 = vpack.c.bf16 %v242_v51, %v241_v50  ;;  %v798_v55 = vpack.c.bf16 %v244_v54, %v243_v53  ;;  %v323_v56 = vld [vmem:[#allocation8] sm:$0xff]  ;;  %v324_v57 = vld [vmem:[#allocation8 + $0x8] sm:$0xff]  ;;  %v325_v58 = vld [vmem:[#allocation8 + $0x10] sm:$0xff] }
  0x66   :  { %761 = vmatprep.subr.bf16.mxu0 %v1012_v0  ;;  %781 = vmatpush3.bf16.msra.mxu1 %v780_v37  ;;  %v801_v59 = vpack.c.bf16 %v324_v57, %v323_v56  ;;  %v326_v60 = vld [vmem:[#allocation8 + $0x18] sm:$0xff]  ;;  %v327_v62 = vld [vmem:[#allocation8 + $0x20] sm:$0xff]  ;;  %v328_v63 = vld [vmem:[#allocation8 + $0x28] sm:$0xff] }
  0x67   :  { %782 = vmatprep.subr.bf16.mxu1 %v1012_v0  ;;  %v804_v61 = vpack.c.bf16 %v326_v60, %v325_v58  ;;  %v807_v2 = vpack.c.bf16 %v328_v63, %v327_v62  ;;  %v329_v3 = vld [vmem:[#allocation8 + $0x30] sm:$0xff]  ;;  %v330_v4 = vld [vmem:[#allocation8 + $0x38] sm:$0xff]  ;;  %v331_v6 = vld [vmem:[#allocation8 + $0x40] sm:$0xff] }
  0x68   :  { %v810_v5 = vpack.c.bf16 %v330_v4, %v329_v3  ;;  %v332_v7 = vld [vmem:[#allocation8 + $0x48] sm:$0xff]  ;;  %v333_v9 = vld [vmem:[#allocation8 + $0x50] sm:$0xff]  ;;  %v334_v10 = vld [vmem:[#allocation8 + $0x58] sm:$0xff] }
  0x69   :  { %763 = vmatpush3.bf16.msra.mxu0 %v762_v13  ;;  %v813_v8 = vpack.c.bf16 %v332_v7, %v331_v6  ;;  %v816_v11 = vpack.c.bf16 %v334_v10, %v333_v9  ;;  %v335_v12 = vld [vmem:[#allocation8 + $0x60] sm:$0xff]  ;;  %v336_v13 = vld [vmem:[#allocation8 + $0x68] sm:$0xff]  ;;  %v539_v24 = vld [vmem:[%s1227_s3] ss:$0 sm:$0xff]  ;;  %v510_v9 = vlaneseq }
  0x6a   :  { %764 = vmatprep.subr.bf16.mxu0 %v1012_v0  ;;  %784 = vmatpush3.bf16.msra.mxu1 %v783_v40  ;;  %v819_v14 = vpack.c.bf16 %v336_v13, %v335_v12  ;;  %v417_v33 = vld [vmem:[#allocation10] sm:$0xff]  ;;  %v418_v34 = vld [vmem:[#allocation10 + $0x8] sm:$0xff]  ;;  %v419_v35 = vld [vmem:[#allocation10 + $0x10] sm:$0xff] }
  0x6b   :  { %785 = vmatprep.subr.bf16.mxu1 %v1012_v0  ;;  %v825_v36 = vpack.c.bf16 %v418_v34, %v417_v33  ;;  %v420_v37 = vld [vmem:[#allocation10 + $0x18] sm:$0xff]  ;;  %v421_v39 = vld [vmem:[#allocation10 + $0x20] sm:$0xff]  ;;  %v422_v40 = vld [vmem:[#allocation10 + $0x28] sm:$0xff] }
  0x6c   :  { %v828_v38 = vpack.c.bf16 %v420_v37, %v419_v35  ;;  %v831_v41 = vpack.c.bf16 %v422_v40, %v421_v39  ;;  %v424_v42 = vld [vmem:[#allocation10 + $0x38] sm:$0xff]  ;;  %v425_v44 = vld [vmem:[#allocation10 + $0x40] sm:$0xff]  ;;  %v426_v45 = vld [vmem:[#allocation10 + $0x48] sm:$0xff] }
  0x6d   :  { %766 = vmatpush3.bf16.msra.mxu0 %v765_v16  ;;  %v427_v47 = vld [vmem:[#allocation10 + $0x50] sm:$0xff]  ;;  %v428_v48 = vld [vmem:[#allocation10 + $0x58] sm:$0xff]  ;;  %v429_v50 = vld [vmem:[#allocation10 + $0x60] sm:$0xff] }
  0x6e   :  { %767 = vmatprep.subr.bf16.mxu0 %v1012_v0  ;;  %787 = vmatpush3.bf16.msra.mxu1 %v786_v43  ;;  %v430_v51 = vld [vmem:[#allocation10 + $0x68] sm:$0xff]  ;;  %v541_v53 = vld [vmem:[%s1230_s6] ss:$0 sm:$0xff]  ;;  %v431_v58 = vld [vmem:[#allocation10 + $0x70] sm:$0xff] }
  0x6f   :  { %788 = vmatprep.subr.bf16.mxu1 %v1012_v0  ;;  %v543_v3 = vld [vmem:[%s1234_s10] ss:$0 sm:$0xff] }
  0x71   :  { %769 = vmatpush3.bf16.msra.mxu0 %v768_v19 }
  0x72   :  { %770 = vmatprep.subr.bf16.mxu0 %v1012_v0  ;;  %790 = vmatpush3.bf16.msra.mxu1 %v789_v46  ;;  %v837_v46 = vpack.c.bf16 %v426_v45, %v425_v44 }
  0x73   :  { %791 = vmatprep.subr.bf16.mxu1 %v1012_v0 }
  0x75   :  { %772 = vmatpush3.bf16.msra.mxu0 %v771_v22 }
  0x76   :  { %773 = vmatprep.subr.bf16.mxu0 %v1012_v0  ;;  %793 = vmatpush3.bf16.msra.mxu1 %v792_v49  ;;  %v840_v49 = vpack.c.bf16 %v428_v48, %v427_v47 }
  0x77   :  { %794 = vmatprep.subr.bf16.mxu1 %v1012_v0 }
  0x79   :  { %775 = vmatpush3.bf16.msra.mxu0 %v774_v25 }
  0x7a   :  { %800 = vmatprep.subr.bf16.mxu0 %v1012_v0  ;;  %796 = vmatpush3.bf16.msra.mxu1 %v795_v52  ;;  %v843_v52 = vpack.c.bf16 %v430_v51, %v429_v50 }
  0x7b   :  { %797 = vmatprep.subr.bf16.mxu1 %v1012_v0 }
  0x7c   :  { %645 = vmatmul.mubr.f32.vlgmr.msra.gmra.mrb[0].mxu0 %v105_v26  ;;  %v540_v26 = vld [vmem:[%s1228_s4] ss:$0 sm:$0xff] }
  0x7d   :  { %714 = vmatprep.mubr.msk.f32.mxu0 %vm1013_vm0, %v1014_v1  ;;  %802 = vmatpush3.bf16.msra.mxu0 %v801_v59  ;;  %v432_v59 = vld [vmem:[#allocation10 + $0x78] sm:$0xff] }
  0x7e   :  { %799 = vmatpush3.bf16.msra.mxu1 %v798_v55  ;;  %803 = vmatprep.subr.bf16.mxu0 %v1012_v0  ;;  %v846_v60 = vpack.c.bf16 %v432_v59, %v431_v58 }
  0x7f   :  { %824 = vmatprep.subr.bf16.mxu1 %v1012_v0 }
  0x81   :  { %805 = vmatpush3.bf16.msra.mxu0 %v804_v61  ;;  %v542_v61 = vld [vmem:[%s1232_s8] ss:$0 sm:$0xff]  ;;  %s1015_s8 = smov [#allocation11]  }
  0x82   :  { %806 = vmatprep.subr.bf16.mxu0 %v1012_v0  ;;  %s527_s25 = sshll.u32 %s1015_s8, 4  ;;  %s528_s25 = int_to_ptr.vmem [resolvable:$true] %s527_s25 }
  0x83   :  { %s975_s26 = scalar_lea.vmem %s528_s25, 128  ;;  %p980_p13 = scmp.lt.s32.totalorder %s528_s25, %s528_s25 }
  0x84   :  { %p976_p12 = scmp.ne.s32.totalorder %s528_s25, %s975_s26  ;;  %p981_p0 = scmp.lt.s32.totalorder %s975_s26, %s975_s26 }
  0x85   :  { %808 = vmatpush3.bf16.msra.mxu0 %v807_v2 }
  0x86   :  { %809 = vmatprep.subr.bf16.mxu0 %v1012_v0  ;;  %p982_p1 = por %p981_p0, %p980_p13 }
  0x88   :  { %p983_p2 = pnand %p982_p1, %p976_p12 }
  0x89   :  { %811 = vmatpush3.bf16.msra.mxu0 %v810_v5 }
  0x8a   :  { %812 = vmatprep.subr.bf16.mxu0 %v1012_v0 }
  0x8d   :  { %814 = vmatpush3.bf16.msra.mxu0 %v813_v8 }
  0x8e   :  { %815 = vmatprep.subr.bf16.mxu0 %v1012_v0 }
  0x91   :  { %817 = vmatpush3.bf16.msra.mxu0 %v816_v11  ;;  %v511_v11 = vand.u32 127, %v510_v9 }
  0x92   :  { %818 = vmatprep.subr.bf16.mxu0 %v1012_v0 }
  0x93   :  { %vm512_vm1 = vcmp.ge.s32.totalorder %v511_v11, 4  ;;  %vm513_vm2 = vcmp.lt.s32.totalorder %v511_v11, 8 }
  0x94   :  { %vm514_vm3 = vmand %vm512_vm1, %vm513_vm2 }
  0x95   :  { %820 = vmatpush3.bf16.msra.mxu0 %v819_v14 }
  0x96   :  { %821 = vmatprep.subr.bf16.mxu0 %v1012_v0 }
 0x14f   :  { %v195_v28 = vpop.f32.mrb[0].mxu0 }
 0x150   :  { %v1167_v29 = vadd.f32 %v538_v27, %v195_v28  ;;  %v646_v30 = vpop.f32.mrb[1].mxu0 }
 0x152   :  { %199 = vadd.xlane.f32.xlu0 %v1167_v29  ;;  %v201_v31 = vmul.f32 %v1167_v29, %v1167_v29 }
 0x156   :  { %202 = vadd.xlane.f32.xlu0 %v201_v31  ;;  %v337_v31 = vld [vmem:[#allocation8 + $0x70] sm:$0xff] }
 0x1df   :  { %v200_v15 = vpop.xlane.xlu0 %199 }
 0x1e0   :  { %v204_v16 = vmul.f32 0.015625, %v200_v15 }
 0x1e2   :  { %v206_v18 = vmul.f32 %v204_v16, %v204_v16  ;;  %v208_v22 = vsub.f32 %v1167_v29, %v204_v16  ;;  %v338_v29 = vld [vmem:[#allocation8 + $0x78] sm:$0xff] }
 0x1e3   :  { %v203_v17 = vpop.xlane.xlu0 %202  ;;  %v822_v32 = vpack.c.bf16 %v338_v29, %v337_v31 }
 0x1e4   :  { %v205_v19 = vmul.f32 0.015625, %v203_v17 }
 0x1e5   :  { %823 = vmatpush3.bf16.msra.mxu0 %v822_v32 }
 0x1e6   :  { %v207_v20 = vsub.f32 %v205_v19, %v206_v18 }
 0x1e8   :  { %v209_v21 = vadd.f32 1e-05, %v207_v20 }
 0x1ea   :  { %859 = vrsqrt.f32 %v209_v21 }
 0x1f4   :  { %v860_v23 = vpop.eup %859 }
 0x1f5   :  { %v211_v25 = vmul.f32 %v860_v23, %v208_v22 }
 0x1f7   :  { %v219_v27 = vmul.f32 %v539_v24, %v211_v25 }
 0x1f9   :  { %v227_v28 = vadd.f32 %v540_v26, %v219_v27 }
 0x1fb   :  { %861 = vtanh.f32 %v227_v28 }
 0x205   :  { %v862_v30 = vpop.eup %861 }
 0x206   :  { %680 = vmatmul.mubr.f32.vlgmr.msra.gmra.mrb[0].mxu1 %v862_v30 }
 0x207   :  { %749 = vmatprep.mubr.msk.f32.mxu1 %vm1013_vm0, %v1014_v1  ;;  %826 = vmatpush3.bf16.msra.mxu1 %v825_v36  ;;  %v423_v1 = vld [vmem:[#allocation10 + $0x30] sm:$0xff] }
 0x208   :  { %827 = vmatprep.subr.bf16.mxu1 %v1012_v0  ;;  %v834_v43 = vpack.c.bf16 %v424_v42, %v423_v1 }
 0x20b   :  { %829 = vmatpush3.bf16.msra.mxu1 %v828_v38 }
 0x20c   :  { %830 = vmatprep.subr.bf16.mxu1 %v1012_v0 }
 0x20f   :  { %832 = vmatpush3.bf16.msra.mxu1 %v831_v41 }
 0x210   :  { %833 = vmatprep.subr.bf16.mxu1 %v1012_v0 }
 0x213   :  { %835 = vmatpush3.bf16.msra.mxu1 %v834_v43 }
 0x214   :  { %836 = vmatprep.subr.bf16.mxu1 %v1012_v0 }
 0x217   :  { %838 = vmatpush3.bf16.msra.mxu1 %v837_v46 }
 0x218   :  { %839 = vmatprep.subr.bf16.mxu1 %v1012_v0 }
 0x21b   :  { %841 = vmatpush3.bf16.msra.mxu1 %v840_v49 }
 0x21c   :  { %842 = vmatprep.subr.bf16.mxu1 %v1012_v0 }
 0x21f   :  { %844 = vmatpush3.bf16.msra.mxu1 %v843_v52 }
 0x220   :  { %845 = vmatprep.subr.bf16.mxu1 %v1012_v0 }
 0x223   :  { %847 = vmatpush3.bf16.msra.mxu1 %v846_v60 }
 0x2d9   :  { %v318_v54 = vpop.f32.mrb[0].mxu1 }
 0x2da   :  { %v319_v55 = vadd.f32 %v541_v53, %v318_v54  ;;  %v681_v56 = vpop.f32.mrb[1].mxu1 }
 0x2dc   :  { %v322_v57 = vmax.f32 %v319_v55, 0.0 }
 0x2de   :  { %715 = vmatmul.mubr.f32.vlgmr.msra.gmra.mrb[2].mxu0 %v322_v57 }
 0x3b1   :  { %v412_v62 = vpop.f32.mrb[2].mxu0 }
 0x3b2   :  { %v413_v63 = vadd.f32 %v542_v61, %v412_v62  ;;  %v716_v0 = vpop.f32.mrb[3].mxu0 }
 0x3b4   :  { %v416_v2 = vmax.f32 %v413_v63, 0.0 }
 0x3b6   :  { %750 = vmatmul.mubr.f32.vlgmr.msra.gmra.mrb[2].mxu1 %v416_v2 }
 0x489   :  { %v506_v4 = vpop.f32.mrb[2].mxu1 }
 0x48a   :  { %v507_v5 = vadd.f32 %v543_v3, %v506_v4  ;;  %v751_v6 = vpop.f32.mrb[3].mxu1 }
 0x48c   :  { %v515_v7 = vmax.f32 %v507_v5, -10.0 }
 0x48e   :  { %v516_v8 = vmin.f32 %v515_v7, 2.0 }
 0x490   :  { %v517_v10 = vmul.f32 1.442695, %v516_v8 }
 0x492   :  { %863 = vpow2.f32 %v517_v10 }
 0x49c   :  { %v864_v12 = vpop.eup %863 }
 0x49d   :  { %v519_v13 = vsel %vm514_vm3, %v864_v12, %v507_v5 }
 0x49e   :  { %520 = vst [vmem:[#allocation11] sm:$0xff] %v519_v13 }
 0x49f   :  { %986 = shalt.err (!%p983_p2)
}
 0x4a0   :  { %s987_s0 = scalar_lea.hbm %s1235_s11, 128 }
 0x4a1   :  { %p988_p3 = scmp.ne.s32.totalorder %s1235_s11, %s987_s0  ;;  %p991_p4 = scmp.lt.u32.totalorder %s987_s0, %s1235_s11 }
 0x4a3   :  { %p993_p5 = pnand %p991_p4, %p988_p3 }
 0x4a5   :  { %996 = shalt.err (!%p993_p5)
}
 0x4a6   :  { %530 = dma.vmem_to_hbm [thread:$0]  %s528_s25, 128, %s1235_s11, [#allocation4]  }
 0x4a7   :  { %1003 = dma.done.wait [#allocation4], 128  }
 0x4a8   :  { %1004 = vsyncadd [#allocation4], 4294967168 }
 0x4a9   :  { %534 = vsyncpa [#allocation3], 1 }
 0x4aa   :  { %535 = vsyncpa [#allocation6], 1 }
 0x4ab   :  { %536 = vsyncpa [#allocation9], 1 }
 0x4ac   :  { %537 = vsyncpa [#allocation4], 1 }

</bundles_post_ra>
